<compile_context>
chip_gen: v7x
topology: tpu7x:2x2x1
jax: 0.10.0
libtpu: 0.0.40
codegen_flags: <defaults>
</compile_context>

<pallas_src>
import functools

import jax
import jax.numpy as jnp
from jax.experimental import pallas as pl
from jax.experimental.pallas import tpu as pltpu

_NEG = -1e30  # sentinel: relu(margin + _NEG - d) == 0 for any realistic inputs


def _round_up(x, m):
    return (x + m - 1) // m * m


def _pick_tile(B, D):
    # 2 (tile, D) f32 streams x 2 pipeline buffers must fit comfortably inside
    # the smallest default scoped-VMEM budget across generations (v5e: 16 MiB).
    budget = 12 * 1024 * 1024
    cands = [t for t in (256, 128) if 2 * 2 * t * D * 4 <= budget]
    if not cands:
        cands = [128]
    # smallest padded batch wins; ties go to the larger tile (fewer grid steps)
    return min(cands, key=lambda t: (_round_up(B, t), -t))


def _contrastive_mixup_kernel(*refs, margin, half, max_violation, has_pad, tile):
    if has_pad:
        im_ref, s_ref, d1_ref, d2_ref, negrow_ref, negcol_ref, *rest = refs
    else:
        im_ref, s_ref, d1_ref, d2_ref, *rest = refs
        negrow_ref = negcol_ref = None
    if max_violation:
        out_row_ref, out_col_ref, vec_ref = rest
    else:
        out_row_ref, vec_ref = rest

    i = pl.program_id(0)
    j = pl.program_id(1)
    nj = pl.num_programs(1)

    # scores tile = im[i-tile] @ s[j-tile]^T on the MXU (f32 accumulation).
    scores = jax.lax.dot_general(
        im_ref[...], s_ref[...], (((1,), (1,)), ((), ())),
        preferred_element_type=jnp.float32)                      # (tile, tile)

    if has_pad:
        # additive -1e30 sentinels on padded rows / cols (precomputed, tiny)
        scores = scores + negrow_ref[...] + negcol_ref[...]

    # Diagonal sentinel only where it can matter (block-diagonal tiles).
    def _mask_diag(sc):
        rl = jax.lax.broadcasted_iota(jnp.int32, (tile, tile), 0)
        cl = jax.lax.broadcasted_iota(jnp.int32, (tile, tile), 1)
        return jnp.where(rl == cl, _NEG, sc)

    scores = jax.lax.cond(i == j, _mask_diag, lambda sc: sc, scores)

    shift_row = scores - d1_ref[...]        # scores - d1  (cost_s terms)
    shift_col = scores - d2_ref[...]        # scores - d2  (cost_im terms)

    if not max_violation:
        if half == margin:                  # margin == 0: mix == org terms
            tile_cost = 2.0 * (jnp.maximum(shift_row, 0.0) +
                               jnp.maximum(shift_col, 0.0))
        else:
            tile_cost = (jnp.maximum(margin + shift_row, 0.0) +
                         jnp.maximum(half + shift_row, 0.0) +
                         jnp.maximum(margin + shift_col, 0.0) +
                         jnp.maximum(half + shift_col, 0.0))
        row_part = jnp.sum(tile_cost, axis=1, keepdims=True)     # (tile, 1)

        @pl.when(j == 0)
        def _():
            vec_ref[...] = row_part

        @pl.when(j > 0)
        def _():
            vec_ref[...] += row_part

        @pl.when(j == nj - 1)
        def _():
            out_row_ref[0] = vec_ref[...]
    else:
        # Running max over j of (scores - d1); relu + margins deferred to the
        # finalize step (monotone, so max commutes with them).
        rmax = jnp.max(shift_row, axis=1, keepdims=True)         # (tile, 1)

        @pl.when(j == 0)
        def _():
            vec_ref[...] = rmax

        @pl.when(j > 0)
        def _():
            vec_ref[...] = jnp.maximum(vec_ref[...], rmax)

        # Per-(i, j) partial column max of (scores - d2); combined (max over i,
        # relu + margins, sum) in the wrapper.  Lane-dense (1, tile) store.
        out_col_ref[0] = jnp.max(shift_col, axis=0, keepdims=True)

        @pl.when(j == nj - 1)
        def _():
            m = vec_ref[...]
            out_row_ref[0] = (jnp.maximum(margin + m, 0.0) +
                              jnp.maximum(half + m, 0.0))


def contrastive_loss_mixup(im, s, lam1=None, lam2=None, *, margin=0.0,
                           max_violation=False):
    """Pallas equivalent of ContrastiveLoss_mixup.forward(im, s).

    lam1/lam2 (the np.random.beta mixup coefficients) are accepted for API
    parity but have no effect on the forward value (the diagonal entries they
    would overwrite are masked to zero before every reduction), so the mixup
    matmul is elided entirely.
    """
    del lam1, lam2
    assert im.ndim == 2 and im.shape == s.shape
    B, D = im.shape
    im = jnp.asarray(im, jnp.float32)
    s = jnp.asarray(s, jnp.float32)
    margin = float(margin)
    half = margin / 2.0

    # Diagonal of im @ s.T, computed once (f32) instead of per grid step.
    dvec = jnp.sum(im * s, axis=1)

    tile = _pick_tile(B, D)
    b_pad = _round_up(B, tile)
    n_blk = b_pad // tile
    has_pad = b_pad != B

    if has_pad:
        pad = b_pad - B
        im = jnp.pad(im, ((0, pad), (0, 0)))
        s = jnp.pad(s, ((0, pad), (0, 0)))
        dvec = jnp.pad(dvec, (0, pad))
        neg = jnp.where(jnp.arange(b_pad) >= B, _NEG, 0.0).astype(jnp.float32)

    d1 = dvec.reshape(b_pad, 1)
    d2 = dvec.reshape(1, b_pad)

    inputs = [im, s, d1, d2]
    in_specs = [
        pl.BlockSpec((tile, D), lambda i, j: (i, 0)),   # im row tile (lhs)
        pl.BlockSpec((tile, D), lambda i, j: (j, 0)),   # s row tile used as cols
        pl.BlockSpec((tile, 1), lambda i, j: (i, 0)),   # d1 slice
        pl.BlockSpec((1, tile), lambda i, j: (0, j)),   # d2 slice
    ]
    if has_pad:
        inputs += [neg.reshape(b_pad, 1), neg.reshape(1, b_pad)]
        in_specs += [
            pl.BlockSpec((tile, 1), lambda i, j: (i, 0)),   # padded-row mask
            pl.BlockSpec((1, tile), lambda i, j: (0, j)),   # padded-col mask
        ]

    out_row_shape = jax.ShapeDtypeStruct((n_blk, tile, 1), jnp.float32)
    out_row_spec = pl.BlockSpec((1, tile, 1), lambda i, j: (i, 0, 0))
    if max_violation:
        out_shape = (out_row_shape,
                     jax.ShapeDtypeStruct((n_blk, 1, b_pad), jnp.float32))
        out_specs = (out_row_spec,
                     pl.BlockSpec((1, 1, tile), lambda i, j: (i, 0, j)))
    else:
        out_shape = out_row_shape
        out_specs = out_row_spec

    kernel = functools.partial(
        _contrastive_mixup_kernel, margin=margin, half=half,
        max_violation=bool(max_violation), has_pad=has_pad, tile=tile)

    result = pl.pallas_call(
        kernel,
        grid=(n_blk, n_blk),
        in_specs=in_specs,
        out_specs=out_specs,
        out_shape=out_shape,
        scratch_shapes=[pltpu.VMEM((tile, 1), jnp.float32)],  # row acc / row max
        compiler_params=pltpu.CompilerParams(
            # i only touches per-row-block outputs -> parallel (megacore on
            # v7x); j carries the running accumulator / row max -> arbitrary.
            dimension_semantics=("parallel", "arbitrary")),
    )(*inputs)

    if max_violation:
        out_row, out_col = result
        col_m = jnp.max(out_col[:, 0, :], axis=0)                 # (b_pad,)
        col_loss = jnp.sum(jnp.maximum(margin + col_m, 0.0) +
                           jnp.maximum(half + col_m, 0.0))
        return jnp.sum(out_row) + col_loss
    return jnp.sum(result)


def _reference(im, s, lam1, lam2, margin=0.0, max_violation=False):
    """Pure-JAX replica of the PyTorch forward for verification."""
    B = im.shape[0]
    scores = im @ s.T
    diag = jnp.diag(scores)[:, None]
    d1 = diag
    d2 = diag.T
    im_mix = lam1 * im + (1.0 - lam1) * s
    s_mix = lam2 * im + (1.0 - lam2) * s
    scores_mix = im_mix @ s_mix.T
    idx = jnp.arange(B)
    scores = scores.at[idx, idx].set(jnp.diag(scores_mix))
    cost_s_mix = jnp.maximum(margin / 2 + scores - d1, 0.0)
    cost_s_org = jnp.maximum(margin + scores - d1, 0.0)
    cost_im_mix = jnp.maximum(margin / 2 + scores - d2, 0.0)
    cost_im_org = jnp.maximum(margin + scores - d2, 0.0)
    eye = jnp.eye(B, dtype=bool)
    cost_s_mix = jnp.where(eye, 0.0, cost_s_mix)
    cost_s_org = jnp.where(eye, 0.0, cost_s_org)
    cost_im_mix = jnp.where(eye, 0.0, cost_im_mix)
    cost_im_org = jnp.where(eye, 0.0, cost_im_org)
    if max_violation:
        cost_s_mix = cost_s_mix.max(axis=1)
        cost_s_org = cost_s_org.max(axis=1)
        cost_im_mix = cost_im_mix.max(axis=0)
        cost_im_org = cost_im_org.max(axis=0)
    return (cost_s_mix.sum() + cost_im_mix.sum()
            + cost_s_org.sum() + cost_im_org.sum())


if __name__ == "__main__":
    def check(B, D, margin, max_violation, key):
        k_im, k_s, k_l1, k_l2 = jax.random.split(key, 4)
        im = jax.random.normal(k_im, (B, D), dtype=jnp.float32)
        s = jax.random.normal(k_s, (B, D), dtype=jnp.float32)
        # np.random.beta(1, 1) equivalents (deterministic); ignored by kernel.
        lam1 = jax.random.beta(k_l1, 1.0, 1.0)
        lam2 = jax.random.beta(k_l2, 1.0, 1.0)
        loss = contrastive_loss_mixup(im, s, lam1, lam2, margin=margin,
                                      max_violation=max_violation)
        loss = jax.block_until_ready(loss)
        ref = _reference(im, s, lam1, lam2, margin=margin,
                         max_violation=max_violation)
        assert jnp.allclose(loss, ref, rtol=2e-3, atol=1e-2), (
            B, D, margin, max_violation, float(loss), float(ref))

    keys = jax.random.split(jax.random.PRNGKey(0), 4)
    check(8, 32, 0.0, False, keys[0])      # tiny batch, single block (VSE0)
    check(8, 32, 0.25, True, keys[1])      # tiny batch, VSE++ (max_violation)
    check(300, 64, 0.1, False, keys[2])    # padded batch, 3x3 tiled grid, sum
    check(300, 64, 0.1, True, keys[3])     # padded batch, tiled, max path
    print("KERNEL_OK")
</pallas_src>

<mosaic_0001>
module attributes {stable_mosaic.version = 11 : i64} {
  func.func @_contrastive_mixup_kernel(%arg0: i32, %arg1: i32, %arg2: memref<128x32xf32, #tpu.memory_space<vmem>>, %arg3: memref<128x32xf32, #tpu.memory_space<vmem>>, %arg4: memref<128x1xf32, #tpu.memory_space<vmem>>, %arg5: memref<1x128xf32, #tpu.memory_space<vmem>>, %arg6: memref<128x1xf32, #tpu.memory_space<vmem>>, %arg7: memref<1x128xf32, #tpu.memory_space<vmem>>, %arg8: memref<1x128x1xf32, #tpu.memory_space<vmem>>, %arg9: memref<128x1xf32, #tpu.memory_space<vmem>>) attributes {dimension_semantics = [#tpu.dimension_semantics<parallel>, #tpu.dimension_semantics<arbitrary>], iteration_bounds = array<i64: 1, 1>, scalar_prefetch = 0 : i64, scratch_operands = 1 : i64, tpu.core_type = #tpu.core_type<tc>, window_params = [{transform_indices = @transform_0, window_bounds = array<i64: 128, 32>}, {transform_indices = @transform_1, window_bounds = array<i64: 128, 32>}, {transform_indices = @transform_2, window_bounds = array<i64: 128, 1>}, {transform_indices = @transform_3, window_bounds = array<i64: 1, 128>}, {transform_indices = @transform_4, window_bounds = array<i64: 128, 1>}, {transform_indices = @transform_5, window_bounds = array<i64: 1, 128>}, {transform_indices = @transform_6, window_bounds = array<i64: 1, 128, 1>}]} {
    %c0 = arith.constant 0 : index
    %c0_0 = arith.constant 0 : index
    %0 = vector.load %arg2[%c0, %c0_0] : memref<128x32xf32, #tpu.memory_space<vmem>>, vector<128x32xf32>
    %c0_1 = arith.constant 0 : index
    %c0_2 = arith.constant 0 : index
    %1 = vector.load %arg3[%c0_1, %c0_2] : memref<128x32xf32, #tpu.memory_space<vmem>>, vector<128x32xf32>
    %cst = arith.constant dense<0.000000e+00> : vector<128x128xf32>
    %2 = tpu.matmul %0, %1, %cst {dimension_numbers = #tpu.dot_dimension_numbers<[1], [1], [0], [0], [0, 0, 1, 0], [], []>} : vector<128x32xf32>, vector<128x32xf32>, vector<128x128xf32> -> vector<128x128xf32>
    %c0_3 = arith.constant 0 : index
    %c0_4 = arith.constant 0 : index
    %3 = vector.load %arg6[%c0_3, %c0_4] : memref<128x1xf32, #tpu.memory_space<vmem>>, vector<128x1xf32>
    %4 = vector.broadcast %3 : vector<128x1xf32> to vector<128x128xf32>
    %5 = arith.addf %2, %4 : vector<128x128xf32>
    %c0_5 = arith.constant 0 : index
    %c0_6 = arith.constant 0 : index
    %6 = vector.load %arg7[%c0_5, %c0_6] : memref<1x128xf32, #tpu.memory_space<vmem>>, vector<1x128xf32>
    %7 = vector.broadcast %6 : vector<1x128xf32> to vector<128x128xf32>
    %8 = arith.addf %5, %7 : vector<128x128xf32>
    %9 = arith.cmpi eq, %arg0, %arg1 : i32
    %10 = arith.extui %9 : i1 to i32
    %c0_i32 = arith.constant 0 : i32
    %11 = arith.cmpi ne, %10, %c0_i32 : i32
    %12 = scf.if %11 -> (vector<128x128xf32>) {
      %37 = tpu.iota {dimensions = array<i32: 0>} : vector<128x128xi32>
      %38 = tpu.iota {dimensions = array<i32: 1>} : vector<128x128xi32>
      %39 = arith.cmpi eq, %37, %38 : vector<128x128xi32>
      %cst_21 = arith.constant -1.000000e+30 : f32
      %40 = vector.broadcast %cst_21 : f32 to vector<128x128xf32>
      %41 = arith.select %39, %40, %8 : vector<128x128xi1>, vector<128x128xf32>
      scf.yield %41 : vector<128x128xf32>
    } else {
      scf.yield %8 : vector<128x128xf32>
    }
    %c0_7 = arith.constant 0 : index
    %c0_8 = arith.constant 0 : index
    %13 = vector.load %arg4[%c0_7, %c0_8] : memref<128x1xf32, #tpu.memory_space<vmem>>, vector<128x1xf32>
    %14 = vector.broadcast %13 : vector<128x1xf32> to vector<128x128xf32>
    %15 = arith.subf %12, %14 : vector<128x128xf32>
    %c0_9 = arith.constant 0 : index
    %c0_10 = arith.constant 0 : index
    %16 = vector.load %arg5[%c0_9, %c0_10] : memref<1x128xf32, #tpu.memory_space<vmem>>, vector<1x128xf32>
    %17 = vector.broadcast %16 : vector<1x128xf32> to vector<128x128xf32>
    %18 = arith.subf %12, %17 : vector<128x128xf32>
    %cst_11 = arith.constant 0.000000e+00 : f32
    %19 = vector.broadcast %cst_11 : f32 to vector<128x128xf32>
    %20 = arith.maximumf %15, %19 : vector<128x128xf32>
    %cst_12 = arith.constant 0.000000e+00 : f32
    %21 = vector.broadcast %cst_12 : f32 to vector<128x128xf32>
    %22 = arith.maximumf %18, %21 : vector<128x128xf32>
    %23 = arith.addf %20, %22 : vector<128x128xf32>
    %cst_13 = arith.constant 2.000000e+00 : f32
    %24 = vector.broadcast %cst_13 : f32 to vector<128x128xf32>
    %25 = arith.mulf %24, %23 : vector<128x128xf32>
    %cst_14 = arith.constant dense<0.000000e+00> : vector<128xf32>
    %26 = vector.multi_reduction <add>, %25, %cst_14 [1] : vector<128x128xf32> to vector<128xf32>
    %27 = vector.shape_cast %26 : vector<128xf32> to vector<128x1xf32>
    %c0_i32_15 = arith.constant 0 : i32
    %28 = arith.cmpi eq, %arg1, %c0_i32_15 : i32
    %29 = arith.extui %28 : i1 to i32
    %c0_i32_16 = arith.constant 0 : i32
    %30 = arith.cmpi ne, %29, %c0_i32_16 : i32
    scf.if %30 {
      %c0_21 = arith.constant 0 : index
      %c0_22 = arith.constant 0 : index
      %37 = vector.load %arg9[%c0_21, %c0_22] : memref<128x1xf32, #tpu.memory_space<vmem>>, vector<128x1xf32>
      tpu.vector_store %arg9[%c0_21, %c0_22], %27 {strides = array<i32>} : memref<128x1xf32, #tpu.memory_space<vmem>>, vector<128x1xf32>,
    } else {
    }
    %c0_i32_17 = arith.constant 0 : i32
    %31 = arith.cmpi sgt, %arg1, %c0_i32_17 : i32
    %32 = arith.extui %31 : i1 to i32
    %c0_i32_18 = arith.constant 0 : i32
    %33 = arith.cmpi ne, %32, %c0_i32_18 : i32
    scf.if %33 {
      %c0_21 = arith.constant 0 : index
      %c0_22 = arith.constant 0 : index
      %37 = vector.load %arg9[%c0_21, %c0_22] : memref<128x1xf32, #tpu.memory_space<vmem>>, vector<128x1xf32>
      %38 = arith.addf %37, %27 : vector<128x1xf32>
      %c0_23 = arith.constant 0 : index
      %c0_24 = arith.constant 0 : index
      %39 = vector.load %arg9[%c0_23, %c0_24] : memref<128x1xf32, #tpu.memory_space<vmem>>, vector<128x1xf32>
      tpu.vector_store %arg9[%c0_23, %c0_24], %38 {strides = array<i32>} : memref<128x1xf32, #tpu.memory_space<vmem>>, vector<128x1xf32>,
    } else {
    }
    %c0_i32_19 = arith.constant 0 : i32
    %34 = arith.cmpi eq, %arg1, %c0_i32_19 : i32
    %35 = arith.extui %34 : i1 to i32
    %c0_i32_20 = arith.constant 0 : i32
    %36 = arith.cmpi ne, %35, %c0_i32_20 : i32
    scf.if %36 {
      %c0_21 = arith.constant 0 : index
      %c0_22 = arith.constant 0 : index
      %37 = vector.load %arg9[%c0_21, %c0_22] : memref<128x1xf32, #tpu.memory_space<vmem>>, vector<128x1xf32>
      %c0_23 = arith.constant 0 : index
      %c0_24 = arith.constant 0 : index
      %c0_25 = arith.constant 0 : index
      %38 = vector.load %arg8[%c0_23, %c0_24, %c0_25] : memref<1x128x1xf32, #tpu.memory_space<vmem>>, vector<1x128x1xf32>
      %39 = vector.shape_cast %38 : vector<1x128x1xf32> to vector<128x1xf32>
      %40 = vector.shape_cast %37 : vector<128x1xf32> to vector<1x128x1xf32>
      tpu.vector_store %arg8[%c0_23, %c0_24, %c0_25], %40 {strides = array<i32>} : memref<1x128x1xf32, #tpu.memory_space<vmem>>, vector<1x128x1xf32>,
    } else {
    }
    return
  }
  func.func @transform_0(%arg0: i32, %arg1: i32) -> (i32, i32) {
    %c0_i32 = arith.constant 0 : i32
    %c0_i32_0 = arith.constant 0 : i32
    return %arg0, %c0_i32 : i32, i32
  }
  func.func @transform_1(%arg0: i32, %arg1: i32) -> (i32, i32) {
    %c0_i32 = arith.constant 0 : i32
    %c0_i32_0 = arith.constant 0 : i32
    return %arg1, %c0_i32 : i32, i32
  }
  func.func @transform_2(%arg0: i32, %arg1: i32) -> (i32, i32) {
    %c0_i32 = arith.constant 0 : i32
    %c0_i32_0 = arith.constant 0 : i32
    return %arg0, %c0_i32 : i32, i32
  }
  func.func @transform_3(%arg0: i32, %arg1: i32) -> (i32, i32) {
    %c0_i32 = arith.constant 0 : i32
    %c0_i32_0 = arith.constant 0 : i32
    return %c0_i32, %arg1 : i32, i32
  }
  func.func @transform_4(%arg0: i32, %arg1: i32) -> (i32, i32) {
    %c0_i32 = arith.constant 0 : i32
    %c0_i32_0 = arith.constant 0 : i32
    return %arg0, %c0_i32 : i32, i32
  }
  func.func @transform_5(%arg0: i32, %arg1: i32) -> (i32, i32) {
    %c0_i32 = arith.constant 0 : i32
    %c0_i32_0 = arith.constant 0 : i32
    return %c0_i32, %arg1 : i32, i32
  }
  func.func @transform_6(%arg0: i32, %arg1: i32) -> (i32, i32, i32) {
    %c0_i32 = arith.constant 0 : i32
    %c0_i32_0 = arith.constant 0 : i32
    %c0_i32_1 = arith.constant 0 : i32
    return %arg0, %c0_i32, %c0_i32_0 : i32, i32, i32
  }
}

</mosaic_0001>

<bundles_post_ra>
// kernel: tpu_custom_call.1
= control target key start
LH: loop header
LB: loop body
LE: loop exit
PB: predicated region body
PF: predicated region fallthrough
CT: control target
= control target key end

     0   :  { %vm151_vm0 = vcmask 261120   ;;  %v1040_v3 = vmov 0   ;;  %s1676_s1 = inlined_call_operand.vmem [shape: f32[128,32], index: 1, kind: input, shape index: {}]   ;;  %s1677_s4 = inlined_call_operand.vmem [shape: f32[128,1], index: 4, kind: input, shape index: {}]   ;;  %s1678_s0 = inlined_call_operand.vmem [shape: f32[128,32], index: 0, kind: input, shape index: {}]   ;;  %s1679_s2 = inlined_call_operand.vmem [shape: f32[128,1], index: 2, kind: input, shape index: {}]   ;;  %s1680_s5 = inlined_call_operand.vmem [shape: f32[1,128], index: 5, kind: input, shape index: {}]   ;;  %s1681_s3 = inlined_call_operand.vmem [shape: f32[1,128], index: 3, kind: input, shape index: {}]   ;;  %s1682_s6 = inlined_call_operand.vmem [shape: f32[1,128,1], index: 6, kind: output, shape index: {}]  }
   0x1   :  { %v39_v0 = vld [vmem:[%s1676_s1] sm:$0xff]  ;;  %v40_v1 = vld [vmem:[%s1676_s1 + $0x8] sm:$0xff]  ;;  %vm1084_vm1 = vmpackc.low %vm151_vm0, %vm151_vm0  ;;  %1039 = vset.pattern.permute.xlu1 %v1040_v3  ;;  %1038 = vset.pattern.permute.xlu0 %v1040_v3 }
   0x2   :  { %v973_v4 = vpack.c.bf16 %v40_v1, %v39_v0  ;;  %v41_v5 = vld [vmem:[%s1676_s1 + $0x10] sm:$0xff]  ;;  %v42_v6 = vld [vmem:[%s1676_s1 + $0x18] sm:$0xff]  ;;  %v43_v9 = vld [vmem:[%s1676_s1 + $0x20] sm:$0xff] }
   0x3   :  { %v979_v7 = vpack.c.bf16 %v42_v6, %v41_v5  ;;  %v57_v8 = vld [vmem:[%s1677_s4 + $0x10] sm:$0xff]  ;;  %v44_v10 = vld [vmem:[%s1676_s1 + $0x28] sm:$0xff]  ;;  %v58_v11 = vld [vmem:[%s1677_s4 + $0x18] sm:$0xff] }
   0x4   :  { %975 = vmatprep.subr.msk.bf16.mxu0 %vm1084_vm1, %v973_v4  ;;  %1021 = vmatprep.subr.msk.bf16.mxu1 %vm1084_vm1, %v973_v4  ;;  %v55_v12 = vld [vmem:[%s1677_s4] sm:$0xff]  ;;  %v985_v15 = vpack.c.bf16 %v44_v10, %v43_v9  ;;  %v60_v16 = vld [vmem:[%s1677_s4 + $0x28] sm:$0xff]  ;;  %v45_v18 = vld [vmem:[%s1676_s1 + $0x30] sm:$0xff] }
   0x5   :  { %978 = vmatpush3.bf16.xpose.msk.msra.mxu0 %vm1084_vm1, %v973_v4  ;;  %1029 = vmatpush3.bf16.xpose.msk.msra.mxu1 %vm1084_vm1, %v973_v4  ;;  %v23_v13 = vld [vmem:[%s1678_s0] sm:$0xff]  ;;  %v56_v17 = vld [vmem:[%s1677_s4 + $0x8] sm:$0xff]  ;;  %v46_v19 = vld [vmem:[%s1676_s1 + $0x38] sm:$0xff] }
   0x6   :  { %981 = vmatprep.subr.msk.bf16.mxu0 %vm1084_vm1, %v979_v7  ;;  %1022 = vmatprep.subr.msk.bf16.mxu1 %vm1084_vm1, %v979_v7  ;;  %v31_v14 = vld [vmem:[%s1678_s0 + $0x40] sm:$0xff]  ;;  %v62_v20 = vld [vmem:[%s1677_s4 + $0x38] sm:$0xff]  ;;  %v991_v22 = vpack.c.bf16 %v46_v19, %v45_v18  ;;  %v64_v23 = vld [vmem:[%s1677_s4 + $0x48] sm:$0xff] }
   0x7   :  { %83 = vperm.xlu1 %1039, %v57_v8   ;;  %73 = vperm.xlu0 %1038, %v55_v12   ;;  %v59_v21 = vld [vmem:[%s1677_s4 + $0x20] sm:$0xff]  ;;  %v61_v24 = vld [vmem:[%s1677_s4 + $0x30] sm:$0xff]  ;;  %v48_v26 = vld [vmem:[%s1676_s1 + $0x48] sm:$0xff] }
   0x8   :  { %949 = vmatprep.mubr.msk.f32.mxu0 %vm151_vm0, %v23_v13  ;;  %961 = vmatprep.mubr.msk.f32.mxu1 %vm151_vm0, %v31_v14  ;;  %v47_v25 = vld [vmem:[%s1676_s1 + $0x40] sm:$0xff]  ;;  %v66_v27 = vld [vmem:[%s1677_s4 + $0x58] sm:$0xff]  ;;  %v68_v30 = vld [vmem:[%s1677_s4 + $0x68] sm:$0xff] }
   0x9   :  { %v63_v28 = vld [vmem:[%s1677_s4 + $0x40] sm:$0xff]  ;;  %v997_v29 = vpack.c.bf16 %v48_v26, %v47_v25  ;;  %v65_v31 = vld [vmem:[%s1677_s4 + $0x50] sm:$0xff]  ;;  %v50_v33 = vld [vmem:[%s1676_s1 + $0x58] sm:$0xff] }
   0xa   :  { %v49_v32 = vld [vmem:[%s1676_s1 + $0x50] sm:$0xff]  ;;  %v70_v34 = vld [vmem:[%s1677_s4 + $0x78] sm:$0xff]  ;;  %v67_v35 = vld [vmem:[%s1677_s4 + $0x60] sm:$0xff] }
   0xb   :  { %88 = vperm.xlu1 %1039, %v58_v11   ;;  %78 = vperm.xlu0 %1038, %v56_v17   ;;  %v1003_v36 = vpack.c.bf16 %v50_v33, %v49_v32  ;;  %v507_v37 = vld [vmem:[%s1679_s2 + $0x8] sm:$0xff]  ;;  %v69_v38 = vld [vmem:[%s1677_s4 + $0x70] sm:$0xff]  ;;  %v51_v39 = vld [vmem:[%s1676_s1 + $0x60] sm:$0xff] }
   0xc   :  { %v52_v40 = vld [vmem:[%s1676_s1 + $0x68] sm:$0xff]  ;;  %v509_v41 = vld [vmem:[%s1679_s2 + $0x18] sm:$0xff]  ;;  %v506_v42 = vld [vmem:[%s1679_s2] sm:$0xff] }
   0xd   :  { %984 = vmatpush3.bf16.xpose.msk.msra.mxu0 %vm1084_vm1, %v979_v7  ;;  %1030 = vmatpush3.bf16.xpose.msk.msra.mxu1 %vm1084_vm1, %v979_v7  ;;  %v1009_v43 = vpack.c.bf16 %v52_v40, %v51_v39  ;;  %v511_v44 = vld [vmem:[%s1679_s2 + $0x28] sm:$0xff]  ;;  %v508_v45 = vld [vmem:[%s1679_s2 + $0x10] sm:$0xff]  ;;  %v54_v47 = vld [vmem:[%s1676_s1 + $0x78] sm:$0xff] }
   0xe   :  { %987 = vmatprep.subr.msk.bf16.mxu0 %vm1084_vm1, %v985_v15  ;;  %1023 = vmatprep.subr.msk.bf16.mxu1 %vm1084_vm1, %v985_v15  ;;  %v53_v46 = vld [vmem:[%s1676_s1 + $0x70] sm:$0xff]  ;;  %v513_v48 = vld [vmem:[%s1679_s2 + $0x38] sm:$0xff]  ;;  %v510_v49 = vld [vmem:[%s1679_s2 + $0x20] sm:$0xff] }
   0xf   :  { %98 = vperm.xlu1 %1039, %v60_v16   ;;  %93 = vperm.xlu0 %1038, %v59_v21   ;;  %v1015_v50 = vpack.c.bf16 %v54_v47, %v53_v46  ;;  %v515_v51 = vld [vmem:[%s1679_s2 + $0x48] sm:$0xff]  ;;  %v512_v52 = vld [vmem:[%s1679_s2 + $0x30] sm:$0xff]  ;;  %v517_v53 = vld [vmem:[%s1679_s2 + $0x58] sm:$0xff] }
  0x10   :  { %v514_v54 = vld [vmem:[%s1679_s2 + $0x40] sm:$0xff]  ;;  %v519_v55 = vld [vmem:[%s1679_s2 + $0x68] sm:$0xff]  ;;  %v516_v56 = vld [vmem:[%s1679_s2 + $0x50] sm:$0xff] }
  0x11   :  { %v521_v57 = vld [vmem:[%s1679_s2 + $0x78] sm:$0xff]  ;;  %v518_v58 = vld [vmem:[%s1679_s2 + $0x60] sm:$0xff]  ;;  %v24_v59 = vld [vmem:[%s1678_s0 + $0x8] sm:$0xff] }
  0x12   :  { %v32_v60 = vld [vmem:[%s1678_s0 + $0x48] sm:$0xff]  ;;  %v25_v61 = vld [vmem:[%s1678_s0 + $0x10] sm:$0xff]  ;;  %v26_v0 = vld [vmem:[%s1678_s0 + $0x18] sm:$0xff] }
  0x13   :  { %108 = vperm.xlu1 %1039, %v62_v20   ;;  %103 = vperm.xlu0 %1038, %v61_v24   ;;  %v33_v62 = vld [vmem:[%s1678_s0 + $0x50] sm:$0xff]  ;;  %v34_v1 = vld [vmem:[%s1678_s0 + $0x58] sm:$0xff]  ;;  %v27_v2 = vld [vmem:[%s1678_s0 + $0x20] sm:$0xff] }
  0x14   :  { %v520_v63 = vld [vmem:[%s1679_s2 + $0x70] sm:$0xff]  ;;  %v35_v3 = vld [vmem:[%s1678_s0 + $0x60] sm:$0xff]  ;;  %v28_v4 = vld [vmem:[%s1678_s0 + $0x28] sm:$0xff] }
  0x15   :  { %990 = vmatpush3.bf16.xpose.msk.msra.mxu0 %vm1084_vm1, %v985_v15  ;;  %1031 = vmatpush3.bf16.xpose.msk.msra.mxu1 %vm1084_vm1, %v985_v15  ;;  %v36_v5 = vld [vmem:[%s1678_s0 + $0x68] sm:$0xff]  ;;  %v29_v6 = vld [vmem:[%s1678_s0 + $0x30] sm:$0xff]  ;;  %v30_v8 = vld [vmem:[%s1678_s0 + $0x38] sm:$0xff] }
  0x16   :  { %993 = vmatprep.subr.msk.bf16.mxu0 %vm1084_vm1, %v991_v22  ;;  %1024 = vmatprep.subr.msk.bf16.mxu1 %vm1084_vm1, %v991_v22  ;;  %v37_v7 = vld [vmem:[%s1678_s0 + $0x70] sm:$0xff]  ;;  %v38_v9 = vld [vmem:[%s1678_s0 + $0x78] sm:$0xff] }
  0x17   :  { %118 = vperm.xlu1 %1039, %v64_v23   ;;  %113 = vperm.xlu0 %1038, %v63_v28  }
  0x1b   :  { %128 = vperm.xlu1 %1039, %v66_v27   ;;  %123 = vperm.xlu0 %1038, %v65_v31  }
  0x1d   :  { %996 = vmatpush3.bf16.xpose.msk.msra.mxu0 %vm1084_vm1, %v991_v22  ;;  %1032 = vmatpush3.bf16.xpose.msk.msra.mxu1 %vm1084_vm1, %v991_v22 }
  0x1e   :  { %999 = vmatprep.subr.msk.bf16.mxu0 %vm1084_vm1, %v997_v29  ;;  %1025 = vmatprep.subr.msk.bf16.mxu1 %vm1084_vm1, %v997_v29 }
  0x1f   :  { %138 = vperm.xlu1 %1039, %v68_v30   ;;  %133 = vperm.xlu0 %1038, %v67_v35  }
  0x23   :  { %148 = vperm.xlu1 %1039, %v70_v34   ;;  %143 = vperm.xlu0 %1038, %v69_v38  }
  0x25   :  { %1002 = vmatpush3.bf16.xpose.msk.msra.mxu0 %vm1084_vm1, %v997_v29  ;;  %1033 = vmatpush3.bf16.xpose.msk.msra.mxu1 %vm1084_vm1, %v997_v29  ;;  %v420_v29 = vlaneseq }
  0x26   :  { %1005 = vmatprep.subr.msk.bf16.mxu0 %vm1084_vm1, %v1003_v36  ;;  %1026 = vmatprep.subr.msk.bf16.mxu1 %vm1084_vm1, %v1003_v36 }
  0x27   :  { %529 = vperm.xlu1 %1039, %v507_v37   ;;  %524 = vperm.xlu0 %1038, %v506_v42   ;;  %v1384_v31 = vshrl.u32 %v420_v29, 7  ;;  %v1389_v34 = vand.u32 127, %v420_v29 }
  0x29   :  { %v422_v33 = vadd.s32 8, %v1384_v31  ;;  %v430_v35 = vadd.s32 72, %v1384_v31  ;;  %v1395_v37 = vadd.s32 64, %v1384_v31  ;;  %v1398_v38 = vadd.s32 24, %v1384_v31 }
  0x2a   :  { %v1401_v39 = vadd.s32 88, %v1384_v31  ;;  %v1410_v42 = vadd.s32 80, %v1384_v31  ;;  %vm439_vm4 = vcmp.eq.s32.totalorder %v1384_v31, %v1389_v34  ;;  %v1421_v46 = vadd.s32 40, %v1384_v31 }
  0x2b   :  { %539 = vperm.xlu1 %1039, %v509_v41   ;;  %534 = vperm.xlu0 %1038, %v508_v45   ;;  %vm440_vm2 = vcmp.eq.s32.totalorder %v422_v33, %v1389_v34  ;;  %v1407_v41 = vadd.s32 16, %v1384_v31  ;;  %vm448_vm3 = vcmp.eq.s32.totalorder %v430_v35, %v1389_v34  ;;  %v1424_v47 = vadd.s32 104, %v1384_v31 }
  0x2c   :  { %vm447_vm5 = vcmp.eq.s32.totalorder %v1395_v37, %v1389_v34  ;;  %vm442_vm6 = vcmp.eq.s32.totalorder %v1398_v38, %v1389_v34  ;;  %vm450_vm7 = vcmp.eq.s32.totalorder %v1401_v39, %v1389_v34  ;;  %vm449_vm9 = vcmp.eq.s32.totalorder %v1410_v42, %v1389_v34 }
  0x2d   :  { %1008 = vmatpush3.bf16.xpose.msk.msra.mxu0 %vm1084_vm1, %v1003_v36  ;;  %1034 = vmatpush3.bf16.xpose.msk.msra.mxu1 %vm1084_vm1, %v1003_v36  ;;  %vm441_vm8 = vcmp.eq.s32.totalorder %v1407_v41, %v1389_v34  ;;  %vm444_vm10 = vcmp.eq.s32.totalorder %v1421_v46, %v1389_v34  ;;  %vm452_vm11 = vcmp.eq.s32.totalorder %v1424_v47, %v1389_v34 }
  0x2e   :  { %1011 = vmatprep.subr.msk.bf16.mxu0 %vm1084_vm1, %v1009_v43  ;;  %1027 = vmatprep.subr.msk.bf16.mxu1 %vm1084_vm1, %v1009_v43 }
  0x2f   :  { %549 = vperm.xlu1 %1039, %v511_v44   ;;  %544 = vperm.xlu0 %1038, %v510_v49   ;;  %v1415_v44 = vld [vmem:[%s1680_s5] ss:$0 sm:$0xff] }
  0x33   :  { %559 = vperm.xlu1 %1039, %v513_v48   ;;  %554 = vperm.xlu0 %1038, %v512_v52  }
  0x35   :  { %1014 = vmatpush3.bf16.xpose.msk.msra.mxu0 %vm1084_vm1, %v1009_v43  ;;  %1035 = vmatpush3.bf16.xpose.msk.msra.mxu1 %vm1084_vm1, %v1009_v43 }
  0x36   :  { %1017 = vmatprep.subr.msk.bf16.mxu0 %vm1084_vm1, %v1015_v50  ;;  %1028 = vmatprep.subr.msk.bf16.mxu1 %vm1084_vm1, %v1015_v50 }
  0x37   :  { %569 = vperm.xlu1 %1039, %v515_v51   ;;  %564 = vperm.xlu0 %1038, %v514_v54   ;;  %v1433_v54 = vadd.s32 32, %v1384_v31 }
  0x39   :  { %vm443_vm12 = vcmp.eq.s32.totalorder %v1433_v54, %v1389_v34 }
  0x3b   :  { %579 = vperm.xlu1 %1039, %v517_v53   ;;  %574 = vperm.xlu0 %1038, %v516_v56  }
  0x3d   :  { %1020 = vmatpush3.bf16.xpose.msk.msra.mxu0 %vm1084_vm1, %v1015_v50  ;;  %1036 = vmatpush3.bf16.xpose.msk.msra.mxu1 %vm1084_vm1, %v1015_v50 }
  0x3f   :  { %589 = vperm.xlu1 %1039, %v519_v55   ;;  %584 = vperm.xlu0 %1038, %v518_v58   ;;  %v1436_v55 = vadd.s32 96, %v1384_v31 }
  0x41   :  { %vm451_vm13 = vcmp.eq.s32.totalorder %v1436_v55, %v1389_v34 }
  0x43   :  { %599 = vperm.xlu1 %1039, %v521_v57   ;;  %594 = vperm.xlu0 %1038, %v520_v63   ;;  %v1457_v63 = vld [vmem:[%s1681_s3] ss:$0 sm:$0xff] }
  0x44   :  { %950 = vmatmul.mubr.msk.f32.vlgmr.msra.gmra.mrb[0].mxu0 %vm151_vm0, %v24_v59  ;;  %962 = vmatmul.mubr.msk.f32.vlgmr.msra.gmra.mrb[0].mxu1 %vm151_vm0, %v32_v60 }
  0x45   :  { %952 = vmatprep.mubr.msk.f32.mxu0 %vm151_vm0, %v25_v61  ;;  %964 = vmatprep.mubr.msk.f32.mxu1 %vm151_vm0, %v33_v62  ;;  %v1452_v62 = vadd.s32 56, %v1384_v31 }
  0x48   :  { %953 = vmatmul.mubr.msk.f32.gmra.mrb[2].mxu0 %vm151_vm0, %v26_v0  ;;  %965 = vmatmul.mubr.msk.f32.gmra.mrb[2].mxu1 %vm151_vm0, %v34_v1 }
  0x49   :  { %955 = vmatprep.mubr.msk.f32.mxu0 %vm151_vm0, %v27_v2  ;;  %967 = vmatprep.mubr.msk.f32.mxu1 %vm151_vm0, %v35_v3 }
  0x4c   :  { %956 = vmatmul.mubr.msk.f32.gmra.mrb[4].mxu0 %vm151_vm0, %v28_v4  ;;  %968 = vmatmul.mubr.msk.f32.gmra.mrb[4].mxu1 %vm151_vm0, %v36_v5 }
  0x4d   :  { %958 = vmatprep.mubr.msk.f32.mxu0 %vm151_vm0, %v29_v6  ;;  %970 = vmatprep.mubr.msk.f32.mxu1 %vm151_vm0, %v37_v7 }
  0x50   :  { %959 = vmatmul.mubr.msk.f32.gmra.mrb[6].mxu0 %vm151_vm0, %v30_v8  ;;  %971 = vmatmul.mubr.msk.f32.gmra.mrb[6].mxu1 %vm151_vm0, %v38_v9  ;;  %vm446_vm0 = vcmp.eq.s32.totalorder %v1452_v62, %v1389_v34 }
  0x86   :  { %v1354_v10 = vpop.permute.xlu1 %83  ;;  %v74_v11 = vpop.permute.xlu0 %73 }
  0x8a   :  { %v1356_v12 = vpop.permute.xlu1 %88  ;;  %v79_v13 = vpop.permute.xlu0 %78 }
  0x8e   :  { %v1358_v14 = vpop.permute.xlu1 %98  ;;  %v1360_v15 = vpop.permute.xlu0 %93 }
  0x92   :  { %v1362_v16 = vpop.permute.xlu1 %108  ;;  %v1364_v17 = vpop.permute.xlu0 %103 }
  0x96   :  { %v119_v18 = vpop.permute.xlu1 %118  ;;  %v114_v19 = vpop.permute.xlu0 %113 }
  0x9a   :  { %v129_v20 = vpop.permute.xlu1 %128  ;;  %v1366_v21 = vpop.permute.xlu0 %123 }
  0x9e   :  { %v1368_v22 = vpop.permute.xlu1 %138  ;;  %v1370_v23 = vpop.permute.xlu0 %133 }
  0xa2   :  { %v1372_v24 = vpop.permute.xlu1 %148  ;;  %v1374_v25 = vpop.permute.xlu0 %143 }
  0xa6   :  { %v1376_v26 = vpop.permute.xlu1 %529  ;;  %v1378_v27 = vpop.permute.xlu0 %524 }
  0xaa   :  { %v1380_v28 = vpop.permute.xlu1 %539  ;;  %v1382_v30 = vpop.permute.xlu0 %534 }
  0xae   :  { %v1386_v32 = vpop.permute.xlu1 %549  ;;  %v1392_v36 = vpop.permute.xlu0 %544 }
  0xb2   :  { %v1403_v40 = vpop.permute.xlu1 %559  ;;  %v1438_v56 = vpop.permute.xlu0 %554 }
  0xb6   :  { %v570_v6 = vpop.permute.xlu1 %569 }
 0x117   :  { %v951_v43 = vpop.f32.mrb[0].mxu0  ;;  %v963_v45 = vpop.f32.mrb[0].mxu1 }
 0x118   :  { %v320_v48 = vadd.f32 %v951_v43, %v79_v13  ;;  %v360_v49 = vadd.f32 %v963_v45, %v119_v18  ;;  %v314_v50 = vpop.f32.mrb[1].mxu0  ;;  %v354_v51 = vpop.f32.mrb[1].mxu1  ;;  %v1476_v13 = vadd.s32 112, %v1384_v31 }
 0x119   :  { %v315_v52 = vadd.f32 %v314_v50, %v74_v11  ;;  %v355_v53 = vadd.f32 %v354_v51, %v114_v19  ;;  %v1472_v11 = vadd.s32 120, %v1384_v31 }
 0x11a   :  { %v401_v57 = vadd.f32 %v1415_v44, %v320_v48  ;;  %v409_v58 = vadd.f32 %v1415_v44, %v360_v49  ;;  %vm453_vm15 = vcmp.eq.s32.totalorder %v1476_v13, %v1389_v34 }
 0x11b   :  { %v400_v59 = vadd.f32 %v1415_v44, %v315_v52  ;;  %v954_v60 = vpop.f32.mrb[2].mxu0  ;;  %v966_v61 = vpop.f32.mrb[2].mxu1  ;;  %v408_v7 = vadd.f32 %v1415_v44, %v355_v53  ;;  %vm454_vm1 = vcmp.eq.s32.totalorder %v1472_v11, %v1389_v34 }
 0x11c   :  { %v456_v0 = vsel %vm440_vm2, -1e+30, %v401_v57  ;;  %v464_v1 = vsel %vm448_vm3, -1e+30, %v409_v58  ;;  %v330_v2 = vadd.f32 %v954_v60, %v1356_v12  ;;  %v370_v3 = vadd.f32 %v966_v61, %v129_v20  ;;  %v324_v4 = vpop.f32.mrb[3].mxu0  ;;  %v364_v5 = vpop.f32.mrb[3].mxu1 }
 0x11d   :  { %v325_v8 = vadd.f32 %v324_v4, %v1354_v10  ;;  %v365_v9 = vadd.f32 %v364_v5, %v1366_v21  ;;  %v427_v12 = vadd.s32 48, %v1384_v31  ;;  %v611_v18 = vsub.f32 %v464_v1, %v570_v6  ;;  %v565_v57 = vpop.permute.xlu0 %564 }
 0x11e   :  { %v634_v19 = vsub.f32 %v464_v1, %v1457_v63  ;;  %v1482_v10 = vsel %vm439_vm4, -1e+30, %v400_v59  ;;  %v403_v20 = vadd.f32 %v1415_v44, %v330_v2  ;;  %v603_v33 = vsub.f32 %v456_v0, %v1376_v26 }
 0x11f   :  { %v957_v21 = vpop.f32.mrb[4].mxu0  ;;  %v969_v29 = vpop.f32.mrb[4].mxu1  ;;  %v626_v35 = vsub.f32 %v456_v0, %v1457_v63  ;;  %v411_v43 = vadd.f32 %v1415_v44, %v370_v3  ;;  %v402_v45 = vadd.f32 %v1415_v44, %v325_v8  ;;  %v463_v51 = vsel %vm447_vm5, -1e+30, %v408_v7 }
 0x120   :  { %v340_v48 = vadd.f32 %v957_v21, %v1358_v14  ;;  %v380_v49 = vadd.f32 %v969_v29, %v1368_v22  ;;  %v334_v50 = vpop.f32.mrb[5].mxu0  ;;  %v374_v31 = vpop.f32.mrb[5].mxu1  ;;  %v410_v52 = vadd.f32 %v1415_v44, %v365_v9  ;;  %v650_v14 = vmax.f32 %v611_v18, 0.0 }
 0x121   :  { %v335_v26 = vadd.f32 %v334_v50, %v1360_v15  ;;  %v375_v53 = vadd.f32 %v374_v31, %v1370_v23  ;;  %v666_v60 = vmax.f32 %v634_v19, 0.0  ;;  %v458_v22 = vsel %vm442_vm6, -1e+30, %v403_v20  ;;  %v575_v18 = vpop.permute.xlu0 %574 }
 0x122   :  { %v405_v58 = vadd.f32 %v1415_v44, %v340_v48  ;;  %v413_v59 = vadd.f32 %v1415_v44, %v380_v49  ;;  %vm445_vm14 = vcmp.eq.s32.totalorder %v427_v12, %v1389_v34  ;;  %v642_v0 = vmax.f32 %v603_v33, 0.0 }
 0x123   :  { %v960_v61 = vpop.f32.mrb[6].mxu0  ;;  %v972_v37 = vpop.f32.mrb[6].mxu1  ;;  %v658_v1 = vmax.f32 %v626_v35, 0.0  ;;  %v1506_v15 = vsel %vm450_vm7, -1e+30, %v411_v43  ;;  %v404_v2 = vadd.f32 %v1415_v44, %v335_v26  ;;  %v412_v38 = vadd.f32 %v1415_v44, %v375_v53 }
 0x124   :  { %v1511_v23 = vsel %vm441_vm8, -1e+30, %v402_v45  ;;  %v344_v3 = vpop.f32.mrb[7].mxu0  ;;  %v384_v4 = vpop.f32.mrb[7].mxu1  ;;  %v465_v5 = vsel %vm449_vm9, -1e+30, %v410_v52  ;;  %v350_v6 = vadd.f32 %v960_v61, %v1362_v16  ;;  %v682_v42 = vadd.f32 %v666_v60, %v650_v14 }
 0x125   :  { %v345_v39 = vadd.f32 %v344_v3, %v1364_v17  ;;  %v385_v7 = vadd.f32 %v384_v4, %v1374_v25  ;;  %v1524_v41 = vsel %vm444_vm10, -1e+30, %v405_v58  ;;  %v1529_v8 = vsel %vm452_vm11, -1e+30, %v413_v59  ;;  %v585_v59 = vpop.permute.xlu0 %584 }
 0x126   :  { %v674_v9 = vadd.f32 %v658_v1, %v642_v0  ;;  %v1534_v16 = vadd.f32 %v972_v37, %v1372_v24  ;;  %v610_v25 = vsub.f32 %v463_v51, %v565_v57  ;;  %v633_v46 = vsub.f32 %v463_v51, %v1457_v63 }
 0x127   :  { %v406_v17 = vadd.f32 %v1415_v44, %v345_v39  ;;  %v459_v47 = vsel %vm443_vm12, -1e+30, %v404_v2  ;;  %v467_v19 = vsel %vm451_vm13, -1e+30, %v412_v38  ;;  %v698_v20 = vmul.f32 2.0, %v682_v42 }
 0x128   :  { %v690_v21 = vmul.f32 2.0, %v674_v9  ;;  %v1545_v29 = vadd.f32 %v1415_v44, %v350_v6  ;;  %v414_v24 = vadd.f32 %v1415_v44, %v385_v7  ;;  %v649_v33 = vmax.f32 %v610_v25, 0.0 }
 0x129   :  { %v665_v35 = vmax.f32 %v633_v46, 0.0  ;;  %v461_v43 = vsel %vm445_vm14, -1e+30, %v406_v17  ;;  %723 = vadd.xlane.f32.xlu0 %v698_v20  ;;  %v602_v54 = vsub.f32 %v1482_v10, %v1378_v27  ;;  %v625_v55 = vsub.f32 %v1482_v10, %v1457_v63  ;;  %v580_v27 = vpop.permute.xlu1 %579 }
 0x12a   :  { %707 = vadd.xlane.f32.xlu1 %v690_v21  ;;  %v612_v45 = vsub.f32 %v465_v5, %v575_v18  ;;  %v635_v49 = vsub.f32 %v465_v5, %v1457_v63  ;;  %v605_v50 = vsub.f32 %v458_v22, %v1380_v28  ;;  %v628_v31 = vsub.f32 %v458_v22, %v1457_v63  ;;  %v595_v21 = vpop.permute.xlu0 %594 }
 0x12b   :  { %v681_v48 = vadd.f32 %v665_v35, %v649_v33  ;;  %v641_v12 = vmax.f32 %v602_v54, 0.0  ;;  %v657_v51 = vmax.f32 %v625_v55, 0.0  ;;  %v606_v26 = vsub.f32 %v459_v47, %v1392_v36 }
 0x12c   :  { %v651_v52 = vmax.f32 %v612_v45, 0.0  ;;  %v667_v57 = vmax.f32 %v635_v49, 0.0  ;;  %v644_v10 = vmax.f32 %v605_v50, 0.0  ;;  %v660_v58 = vmax.f32 %v628_v31, 0.0 }
 0x12d   :  { %v697_v53 = vmul.f32 2.0, %v681_v48  ;;  %v673_v14 = vadd.f32 %v657_v51, %v641_v12  ;;  %v629_v60 = vsub.f32 %v459_v47, %v1457_v63  ;;  %v645_v28 = vmax.f32 %v606_v26, 0.0 }
 0x12e   :  { %v613_v22 = vsub.f32 %v1506_v15, %v580_v27  ;;  %v683_v61 = vadd.f32 %v667_v57, %v651_v52  ;;  %v676_v37 = vadd.f32 %v660_v58, %v644_v10  ;;  %v636_v0 = vsub.f32 %v1506_v15, %v1457_v63 }
 0x12f   :  { %721 = vadd.xlane.f32.xlu1 %v697_v53  ;;  %v614_v1 = vsub.f32 %v467_v19, %v585_v59  ;;  %v689_v36 = vmul.f32 2.0, %v673_v14  ;;  %v661_v2 = vmax.f32 %v629_v60, 0.0  ;;  %v637_v3 = vsub.f32 %v467_v19, %v1457_v63 }
 0x130   :  { %v652_v38 = vmax.f32 %v613_v22, 0.0  ;;  %v469_v4 = vsel %vm453_vm15, -1e+30, %v414_v24  ;;  %v699_v5 = vmul.f32 2.0, %v683_v61  ;;  %v668_v6 = vmax.f32 %v636_v0, 0.0 }
 0x131   :  { %v653_v39 = vmax.f32 %v614_v1, 0.0  ;;  %705 = vadd.xlane.f32.xlu0 %v689_v36  ;;  %v677_v7 = vadd.f32 %v661_v2, %v645_v28  ;;  %v669_v42 = vmax.f32 %v637_v3, 0.0  ;;  %v604_v9 = vsub.f32 %v1511_v23, %v1382_v30 }
 0x132   :  { %v627_v15 = vsub.f32 %v1511_v23, %v1457_v63  ;;  %v692_v17 = vmul.f32 2.0, %v676_v37  ;;  %v684_v25 = vadd.f32 %v668_v6, %v652_v38  ;;  %v608_v46 = vsub.f32 %v461_v43, %v1438_v56 }
 0x133   :  { %725 = vadd.xlane.f32.xlu1 %v699_v5  ;;  %v631_v13 = vsub.f32 %v461_v43, %v1457_v63  ;;  %v693_v18 = vmul.f32 2.0, %v677_v7  ;;  %v643_v47 = vmax.f32 %v604_v9, 0.0  ;;  %v607_v20 = vsub.f32 %v1524_v41, %v1386_v32  ;;  %v590_v43 = vpop.permute.xlu1 %589 }
 0x134   :  { %v659_v19 = vmax.f32 %v627_v15, 0.0  ;;  %v685_v24 = vadd.f32 %v669_v42, %v653_v39  ;;  %v647_v33 = vmax.f32 %v608_v46, 0.0  ;;  %v630_v23 = vsub.f32 %v1524_v41, %v1457_v63 }
 0x135   :  { %v663_v30 = vmax.f32 %v631_v13, 0.0  ;;  %v415_v35 = vadd.f32 %v1415_v44, %v1534_v16  ;;  %711 = vadd.xlane.f32.xlu0 %v692_v17  ;;  %v616_v56 = vsub.f32 %v469_v4, %v595_v21  ;;  %v462_v32 = vsel %vm446_vm0, -1e+30, %v1545_v29 }
 0x136   :  { %v700_v54 = vmul.f32 2.0, %v684_v25  ;;  %v675_v55 = vadd.f32 %v659_v19, %v643_v47  ;;  %v639_v45 = vsub.f32 %v469_v4, %v1457_v63  ;;  %v646_v41 = vmax.f32 %v607_v20, 0.0 }
 0x137   :  { %713 = vadd.xlane.f32.xlu1 %v693_v18  ;;  %v662_v48 = vmax.f32 %v630_v23, 0.0  ;;  %v615_v44 = vsub.f32 %v1529_v8, %v590_v43  ;;  %v638_v16 = vsub.f32 %v1529_v8, %v1457_v63  ;;  %v701_v49 = vmul.f32 2.0, %v685_v24  ;;  %v600_v10 = vpop.permute.xlu1 %599 }
 0x138   :  { %v679_v50 = vadd.f32 %v663_v30, %v647_v33  ;;  %v655_v31 = vmax.f32 %v616_v56, 0.0  ;;  %v671_v12 = vmax.f32 %v639_v45, 0.0  ;;  %v470_v62 = vsel %vm454_vm1, -1e+30, %v415_v35 }
 0x139   :  { %727 = vadd.xlane.f32.xlu0 %v700_v54  ;;  %v691_v29 = vmul.f32 2.0, %v675_v55  ;;  %v609_v51 = vsub.f32 %v462_v32, %v1403_v40  ;;  %v678_v52 = vadd.f32 %v662_v48, %v646_v41  ;;  %v654_v26 = vmax.f32 %v615_v44, 0.0 }
 0x13a   :  { %v670_v27 = vmax.f32 %v638_v16, 0.0  ;;  %v632_v53 = vsub.f32 %v462_v32, %v1457_v63  ;;  %v695_v57 = vmul.f32 2.0, %v679_v50  ;;  %v687_v8 = vadd.f32 %v671_v12, %v655_v31 }
 0x13b   :  { %729 = vadd.xlane.f32.xlu1 %v701_v49  ;;  %v648_v58 = vmax.f32 %v609_v51, 0.0  ;;  %v617_v59 = vsub.f32 %v470_v62, %v600_v10  ;;  %v694_v14 = vmul.f32 2.0, %v678_v52  ;;  %v640_v11 = vsub.f32 %v470_v62, %v1457_v63 }
 0x13c   :  { %v686_v60 = vadd.f32 %v670_v27, %v654_v26  ;;  %v664_v34 = vmax.f32 %v632_v53, 0.0  ;;  %v703_v28 = vmul.f32 2.0, %v687_v8  ;;  %vm741_vm2 = vcmask 7168  }
 0x13d   :  { %709 = vadd.xlane.f32.xlu0 %v691_v29  ;;  %v656_v61 = vmax.f32 %v617_v59, 0.0  ;;  %v672_v37 = vmax.f32 %v640_v11, 0.0 }
 0x13e   :  { %v702_v40 = vmul.f32 2.0, %v686_v60  ;;  %v680_v22 = vadd.f32 %v664_v34, %v648_v58 }
 0x13f   :  { %717 = vadd.xlane.f32.xlu1 %v695_v57  ;;  %v688_v1 = vadd.f32 %v672_v37, %v656_v61 }
 0x140   :  { %v696_v0 = vmul.f32 2.0, %v680_v22 }
 0x141   :  { %715 = vadd.xlane.f32.xlu0 %v694_v14  ;;  %v704_v36 = vmul.f32 2.0, %v688_v1 }
 0x143   :  { %733 = vadd.xlane.f32.xlu1 %v703_v28 }
 0x145   :  { %731 = vadd.xlane.f32.xlu0 %v702_v40 }
 0x149   :  { %719 = vadd.xlane.f32.xlu0 %v696_v0 }
 0x14d   :  { %735 = vadd.xlane.f32.xlu0 %v704_v36 }
 0x1b6   :  { %v724_v2 = vpop.xlane.xlu0 %723 }
 0x1b7   :  { %v708_v38 = vpop.xlane.xlu1 %707  ;;  %751 = vst.msk [vmem:[#allocation2 + $0x48] sm:$0xff] %vm741_vm2, %v724_v2 }
 0x1b8   :  { %743 = vst.msk [vmem:[#allocation2 + $0x8] sm:$0xff] %vm741_vm2, %v708_v38 }
 0x1bc   :  { %v722_v63 = vpop.xlane.xlu1 %721 }
 0x1bd   :  { %750 = vst.msk [vmem:[#allocation2 + $0x40] sm:$0xff] %vm741_vm2, %v722_v63 }
 0x1be   :  { %v823_v3 = vld [vmem:[#allocation2 + $0x48] sm:$0xff]  ;;  %v706_v5 = vpop.xlane.xlu0 %705 }
 0x1bf   :  { %v815_v4 = vld [vmem:[#allocation2 + $0x8] sm:$0xff]  ;;  %840 = vst.msk [vmem:[%s1682_s6 + $0x48] sm:$0xff] %vm741_vm2, %v823_v3  ;;  %742 = vst.msk [vmem:[#allocation2] sm:$0xff] %vm741_vm2, %v706_v5 }
 0x1c0   :  { %832 = vst.msk [vmem:[%s1682_s6 + $0x8] sm:$0xff] %vm741_vm2, %v815_v4  ;;  %v726_v6 = vpop.xlane.xlu1 %725 }
 0x1c1   :  { %752 = vst.msk [vmem:[#allocation2 + $0x50] sm:$0xff] %vm741_vm2, %v726_v6 }
 0x1c2   :  { %v712_v39 = vpop.xlane.xlu0 %711 }
 0x1c3   :  { %745 = vst.msk [vmem:[#allocation2 + $0x18] sm:$0xff] %vm741_vm2, %v712_v39 }
 0x1c4   :  { %v822_v7 = vld [vmem:[#allocation2 + $0x40] sm:$0xff]  ;;  %v714_v42 = vpop.xlane.xlu1 %713 }
 0x1c5   :  { %839 = vst.msk [vmem:[%s1682_s6 + $0x40] sm:$0xff] %vm741_vm2, %v822_v7  ;;  %746 = vst.msk [vmem:[#allocation2 + $0x20] sm:$0xff] %vm741_vm2, %v714_v42 }
 0x1c6   :  { %v814_v9 = vld [vmem:[#allocation2] sm:$0xff]  ;;  %v728_v15 = vpop.xlane.xlu0 %727 }
 0x1c7   :  { %831 = vst.msk [vmem:[%s1682_s6] sm:$0xff] %vm741_vm2, %v814_v9  ;;  %753 = vst.msk [vmem:[#allocation2 + $0x58] sm:$0xff] %vm741_vm2, %v728_v15 }
 0x1c8   :  { %v824_v17 = vld [vmem:[#allocation2 + $0x50] sm:$0xff]  ;;  %v730_v25 = vpop.xlane.xlu1 %729 }
 0x1c9   :  { %841 = vst.msk [vmem:[%s1682_s6 + $0x50] sm:$0xff] %vm741_vm2, %v824_v17  ;;  %754 = vst.msk [vmem:[#allocation2 + $0x60] sm:$0xff] %vm741_vm2, %v730_v25 }
 0x1ca   :  { %v817_v46 = vld [vmem:[#allocation2 + $0x18] sm:$0xff]  ;;  %v710_v13 = vpop.xlane.xlu0 %709 }
 0x1cb   :  { %834 = vst.msk [vmem:[%s1682_s6 + $0x18] sm:$0xff] %vm741_vm2, %v817_v46  ;;  %744 = vst.msk [vmem:[#allocation2 + $0x10] sm:$0xff] %vm741_vm2, %v710_v13 }
 0x1cc   :  { %v818_v18 = vld [vmem:[#allocation2 + $0x20] sm:$0xff]  ;;  %v718_v47 = vpop.xlane.xlu1 %717 }
 0x1cd   :  { %835 = vst.msk [vmem:[%s1682_s6 + $0x20] sm:$0xff] %vm741_vm2, %v818_v18  ;;  %748 = vst.msk [vmem:[#allocation2 + $0x30] sm:$0xff] %vm741_vm2, %v718_v47 }
 0x1ce   :  { %v825_v19 = vld [vmem:[#allocation2 + $0x58] sm:$0xff]  ;;  %v716_v20 = vpop.xlane.xlu0 %715 }
 0x1cf   :  { %842 = vst.msk [vmem:[%s1682_s6 + $0x58] sm:$0xff] %vm741_vm2, %v825_v19  ;;  %747 = vst.msk [vmem:[#allocation2 + $0x28] sm:$0xff] %vm741_vm2, %v716_v20 }
 0x1d0   :  { %v826_v21 = vld [vmem:[#allocation2 + $0x60] sm:$0xff]  ;;  %v734_v24 = vpop.xlane.xlu1 %733 }
 0x1d1   :  { %843 = vst.msk [vmem:[%s1682_s6 + $0x60] sm:$0xff] %vm741_vm2, %v826_v21  ;;  %756 = vst.msk [vmem:[#allocation2 + $0x70] sm:$0xff] %vm741_vm2, %v734_v24 }
 0x1d2   :  { %v816_v33 = vld [vmem:[#allocation2 + $0x10] sm:$0xff]  ;;  %v732_v30 = vpop.xlane.xlu0 %731 }
 0x1d3   :  { %833 = vst.msk [vmem:[%s1682_s6 + $0x10] sm:$0xff] %vm741_vm2, %v816_v33  ;;  %755 = vst.msk [vmem:[#allocation2 + $0x68] sm:$0xff] %vm741_vm2, %v732_v30 }
 0x1d4   :  { %v820_v23 = vld [vmem:[#allocation2 + $0x30] sm:$0xff] }
 0x1d5   :  { %837 = vst.msk [vmem:[%s1682_s6 + $0x30] sm:$0xff] %vm741_vm2, %v820_v23 }
 0x1d6   :  { %v819_v35 = vld [vmem:[#allocation2 + $0x28] sm:$0xff]  ;;  %v720_v56 = vpop.xlane.xlu0 %719 }
 0x1d7   :  { %836 = vst.msk [vmem:[%s1682_s6 + $0x28] sm:$0xff] %vm741_vm2, %v819_v35  ;;  %749 = vst.msk [vmem:[#allocation2 + $0x38] sm:$0xff] %vm741_vm2, %v720_v56 }
 0x1d8   :  { %v828_v43 = vld [vmem:[#allocation2 + $0x70] sm:$0xff] }
 0x1d9   :  { %845 = vst.msk [vmem:[%s1682_s6 + $0x70] sm:$0xff] %vm741_vm2, %v828_v43 }
 0x1da   :  { %v827_v32 = vld [vmem:[#allocation2 + $0x68] sm:$0xff]  ;;  %v736_v54 = vpop.xlane.xlu0 %735 }
 0x1db   :  { %844 = vst.msk [vmem:[%s1682_s6 + $0x68] sm:$0xff] %vm741_vm2, %v827_v32  ;;  %757 = vst.msk [vmem:[#allocation2 + $0x78] sm:$0xff] %vm741_vm2, %v736_v54 }
 0x1de   :  { %v821_v55 = vld [vmem:[#allocation2 + $0x38] sm:$0xff] }
 0x1df   :  { %838 = vst.msk [vmem:[%s1682_s6 + $0x38] sm:$0xff] %vm741_vm2, %v821_v55 }
 0x1e2   :  { %v829_v45 = vld [vmem:[#allocation2 + $0x78] sm:$0xff] }
 0x1e3   :  { %846 = vst.msk [vmem:[%s1682_s6 + $0x78] sm:$0xff] %vm741_vm2, %v829_v45 }

</bundles_post_ra>
